<compile_context>
chip_gen: v6e
topology: v6e:2x2x1
jax: 0.10.0
libtpu: 0.0.40
codegen_flags: <defaults>
</compile_context>

<pallas_src>
import jax
import jax.numpy as jnp
from jax.experimental import pallas as pl
from jax.experimental.pallas import tpu as pltpu

# Toy hyper-params consistent with the wrapped model's forward signature.
B, T, H, V = 2, 16, 32, 64     # batch, seq, hidden, vocab
N = B * T

_MASK = -1e30                  # finite "-inf" for padded vocab columns / running max init


# --------------------------------------------------------------------------- helpers
def _round_up(x, m):
    return (x + m - 1) // m * m


def _choose_row_tile(n):
    # Row tiles are multiples of 16 so bf16 logits blocks are sublane-packed cleanly.
    n16 = _round_up(n, 16)
    if n16 <= 16:
        return 16
    # >=2 row tiles whenever possible so the "parallel" row axis can shard across the
    # two TensorCores of a v7x chip; 512 is the large-problem baseline (fits v7x 64 MiB
    # VMEM comfortably, v5e/v6e's 128 MiB get extra headroom).
    return min(512, max(16, (n16 // 2) // 16 * 16))


def _choose_vocab_pad_and_tile(v):
    # 1024-wide lane-dense vocab tiles feed the 2x256^2 MXUs on v6e/v7x well and keep
    # the per-grid-step fixed cost (~0.35 us) amortized; small vocabs are one full tile.
    if v > 1024:
        v_pad = _round_up(v, 1024)
        return v_pad, 1024
    v_pad = _round_up(v, 128)
    return v_pad, v_pad


def _choose_hidden_pad_and_tile(h):
    if h <= 1024:
        return h, h                 # single k-step; block == full dim is always legal
    return _round_up(h, 512), 512


def _vmem_limit(tm, tn, tk, *, single_k, with_ce):
    """Real double-buffered byte accounting + margin, capped by physical VMEM."""
    inputs = 2 * (tm * tk * 2 + tk * tn * 2 + tn * 4)          # x(bf16), w(bf16), b(f32)
    outputs = 2 * (tm * tn * 2)                                # logits (bf16)
    scratch = 0
    if not single_k:
        scratch += tm * tn * 4                                 # f32 accumulator
    if with_ce:
        inputs += 2 * (tm * 4)                                 # labels (int32)
        outputs += 2 * (8 * 128 * 4)                           # per-row-tile loss block
        scratch += 3 * tm * 4                                  # m / l / t running stats
    est = int((inputs + outputs + scratch) * 1.25) + (2 << 20) # compiler-internal margin
    cap = 48 << 20                                             # safe for v7x (64 MiB phys)
    try:
        cap = int(pltpu.get_tpu_info().vmem_capacity_bytes * 3 // 4)
    except Exception:
        pass
    return max(16 << 20, min(cap, est))


def _pad_axis(a, axis, new_size, value=0):
    if a.shape[axis] == new_size:
        return a
    widths = [(0, 0)] * a.ndim
    widths[axis] = (0, new_size - a.shape[axis])
    return jnp.pad(a, widths, constant_values=value)


def prepare_lm_head(w, b, hidden_tiling=None):
    """One-time pad + bf16 cast of lm-head params (hoisted out of the per-call path)."""
    h, v = w.shape
    v_pad, tn = _choose_vocab_pad_and_tile(v)
    if hidden_tiling is None:
        h_pad, tk = _choose_hidden_pad_and_tile(h)
    else:
        h_pad, tk = hidden_tiling
    wp = _pad_axis(_pad_axis(w, 0, h_pad), 1, v_pad).astype(jnp.bfloat16)
    # Bias-padding trick: padded vocab columns hold -1e30 (padded w columns are 0),
    # so acc + b is already "-inf" there and the CE epilogue needs no masking.
    bp = _pad_axis(b.reshape(1, v).astype(jnp.float32), 1, v_pad, value=_MASK)
    return {"w": wp, "b": bp, "h": h, "v": v,
            "h_pad": h_pad, "v_pad": v_pad, "tn": tn, "tk": tk}


# --------------------------------------------------------------------------- kernels
def _logits_kernel_single_k(x_ref, w_ref, b_ref, logits_ref):
    """Single k-step lm-head: logits = x @ w + b, written straight out (no accumulator)."""
    logits_ref[...] = (jnp.dot(x_ref[...], w_ref[...],
                               preferred_element_type=jnp.float32)
                       + b_ref[...]).astype(logits_ref.dtype)


def _logits_kernel_multi_k(x_ref, w_ref, b_ref, logits_ref, acc_ref):
    """Tiled lm-head projection with f32 VMEM accumulation over the hidden axis."""
    k = pl.program_id(2)

    @pl.when(k == 0)
    def _init():
        acc_ref[...] = jnp.zeros(acc_ref.shape, jnp.float32)

    acc_ref[...] += jnp.dot(x_ref[...], w_ref[...],
                            preferred_element_type=jnp.float32)

    @pl.when(k == pl.num_programs(2) - 1)
    def _store():
        logits_ref[...] = (acc_ref[...] + b_ref[...]).astype(logits_ref.dtype)


def _make_ce_kernel_single_k(tn):
    """lm-head + online (flash-style) cross-entropy, hidden dim in one k-step."""

    def kernel(x_ref, w_ref, b_ref, lbl_ref, logits_ref, loss_ref,
               m_ref, l_ref, t_ref):
        j = pl.program_id(1)
        nv = pl.num_programs(1)

        @pl.when(j == 0)
        def _init_stats():                      # per-row-tile running LSE state
            m_ref[...] = jnp.full(m_ref.shape, _MASK, jnp.float32)
            l_ref[...] = jnp.zeros(l_ref.shape, jnp.float32)
            t_ref[...] = jnp.zeros(t_ref.shape, jnp.float32)

        logits = (jnp.dot(x_ref[...], w_ref[...],
                          preferred_element_type=jnp.float32) + b_ref[...])   # (tm, tn) f32
        logits_ref[...] = logits.astype(logits_ref.dtype)                     # bf16 writeback

        # Padded vocab columns already hold -1e30 via the bias padding -> no masking.
        m_prev = m_ref[...]
        m_new = jnp.maximum(m_prev, jnp.max(logits, axis=-1, keepdims=True))
        alpha = jnp.exp(m_prev - m_new)
        p = jnp.exp(logits - m_new)
        l_ref[...] = alpha * l_ref[...] + jnp.sum(p, axis=-1, keepdims=True)
        m_ref[...] = m_new

        lbl = lbl_ref[...]                                                    # (tm, 1) int32
        col = j * tn + jax.lax.broadcasted_iota(jnp.int32, logits.shape, 1)
        hit = col == lbl                  # padded / ignored rows (label=-1) never hit
        t_ref[...] += jnp.sum(jnp.where(hit, logits, 0.0), axis=-1, keepdims=True)

        @pl.when(j == nv - 1)
        def _finalize():
            lse = m_ref[...] + jnp.log(l_ref[...])
            per_tok = jnp.where(lbl >= 0, lse - t_ref[...], 0.0)              # (tm, 1)
            tile_sum = jnp.sum(per_tok, keepdims=True)                        # (1, 1)
            # One lane-dense (8,128) partial-sum block per row tile (unmasked vst);
            # the scalar is splatted over the block, host reads element [8*i, 0].
            loss_ref[...] = jnp.zeros(loss_ref.shape, jnp.float32) + tile_sum

    return kernel


def _make_ce_kernel_multi_k(tn):
    """lm-head + online cross-entropy with f32 accumulation over the hidden axis."""

    def kernel(x_ref, w_ref, b_ref, lbl_ref, logits_ref, loss_ref,
               acc_ref, m_ref, l_ref, t_ref):
        j = pl.program_id(1)
        k = pl.program_id(2)
        nv = pl.num_programs(1)
        nk = pl.num_programs(2)

        @pl.when(jnp.logical_and(j == 0, k == 0))
        def _init_stats():
            m_ref[...] = jnp.full(m_ref.shape, _MASK, jnp.float32)
            l_ref[...] = jnp.zeros(l_ref.shape, jnp.float32)
            t_ref[...] = jnp.zeros(t_ref.shape, jnp.float32)

        @pl.when(k == 0)
        def _init_acc():
            acc_ref[...] = jnp.zeros(acc_ref.shape, jnp.float32)

        acc_ref[...] += jnp.dot(x_ref[...], w_ref[...],
                                preferred_element_type=jnp.float32)

        @pl.when(k == nk - 1)
        def _epilogue():
            logits = acc_ref[...] + b_ref[...]                                # (tm, tn) f32
            logits_ref[...] = logits.astype(logits_ref.dtype)                 # bf16 writeback

            m_prev = m_ref[...]
            m_new = jnp.maximum(m_prev, jnp.max(logits, axis=-1, keepdims=True))
            alpha = jnp.exp(m_prev - m_new)
            p = jnp.exp(logits - m_new)
            l_ref[...] = alpha * l_ref[...] + jnp.sum(p, axis=-1, keepdims=True)
            m_ref[...] = m_new

            lbl = lbl_ref[...]
            col = j * tn + jax.lax.broadcasted_iota(jnp.int32, logits.shape, 1)
            hit = col == lbl
            t_ref[...] += jnp.sum(jnp.where(hit, logits, 0.0), axis=-1, keepdims=True)

        @pl.when(jnp.logical_and(k == nk - 1, j == nv - 1))
        def _finalize():
            lbl = lbl_ref[...]
            lse = m_ref[...] + jnp.log(l_ref[...])
            per_tok = jnp.where(lbl >= 0, lse - t_ref[...], 0.0)
            tile_sum = jnp.sum(per_tok, keepdims=True)
            loss_ref[...] = jnp.zeros(loss_ref.shape, jnp.float32) + tile_sum

    return kernel


# --------------------------------------------------------------------------- host side
def lm_head_fused(x, prep, labels=None):
    """x:(n,h) f32, prep: output of prepare_lm_head, labels: optional (n,) int32 (-1 = ignore).

    Returns (logits (n,v) bf16, summed-CE-over-valid-tokens or None).
    """
    n, h = x.shape
    if h != prep["h"]:
        raise ValueError("hidden dim mismatch with prepared lm-head params")
    v, v_pad, tn = prep["v"], prep["v_pad"], prep["tn"]
    h_pad, tk = prep["h_pad"], prep["tk"]

    tm = _choose_row_tile(n)
    n_pad = _round_up(n, tm)
    nk = h_pad // tk
    single_k = nk == 1

    # bf16 MXU operands (2x MXU throughput, half the bytes); f32 accumulation in-kernel.
    xp = _pad_axis(_pad_axis(x, 0, n_pad), 1, h_pad).astype(jnp.bfloat16)
    wp, bp = prep["w"], prep["b"]

    if single_k:
        grid = (n_pad // tm, v_pad // tn)
        x_spec = pl.BlockSpec((tm, tk), lambda i, j: (i, 0))
        # TODO(synk): on v5e, if profiling shows exposed DMA, add
        # pipeline_mode=pl.Buffered(3) to w_spec to hide the weight-tile stream.
        w_spec = pl.BlockSpec((tk, tn), lambda i, j: (0, j))
        b_spec = pl.BlockSpec((1, tn), lambda i, j: (0, j))
        logits_spec = pl.BlockSpec((tm, tn), lambda i, j: (i, j))
        lbl_spec = pl.BlockSpec((tm, 1), lambda i, j: (i, 0))
        loss_spec = pl.BlockSpec((8, 128), lambda i, j: (i, 0))
    else:
        grid = (n_pad // tm, v_pad // tn, nk)
        x_spec = pl.BlockSpec((tm, tk), lambda i, j, k: (i, k))
        w_spec = pl.BlockSpec((tk, tn), lambda i, j, k: (k, j))
        b_spec = pl.BlockSpec((1, tn), lambda i, j, k: (0, j))
        logits_spec = pl.BlockSpec((tm, tn), lambda i, j, k: (i, j))
        lbl_spec = pl.BlockSpec((tm, 1), lambda i, j, k: (i, 0))
        loss_spec = pl.BlockSpec((8, 128), lambda i, j, k: (i, 0))

    with_ce = labels is not None
    vmem_limit = _vmem_limit(tm, tn, tk, single_k=single_k, with_ce=with_ce)

    if not with_ce:
        # Inference path: no CE epilogue, no loss output, fully parallel output axes.
        kernel = _logits_kernel_single_k if single_k else _logits_kernel_multi_k
        scratch = [] if single_k else [pltpu.VMEM((tm, tn), jnp.float32)]
        sems = (("parallel", "parallel") if single_k
                else ("parallel", "parallel", "arbitrary"))
        logits = pl.pallas_call(
            kernel,
            out_shape=jax.ShapeDtypeStruct((n_pad, v_pad), jnp.bfloat16),
            grid_spec=pltpu.PrefetchScalarGridSpec(
                num_scalar_prefetch=0,
                grid=grid,
                in_specs=[x_spec, w_spec, b_spec],
                out_specs=logits_spec,
                scratch_shapes=scratch,
            ),
            compiler_params=pltpu.CompilerParams(
                dimension_semantics=sems,
                vmem_limit_bytes=vmem_limit,
            ),
        )(xp, wp, bp)
        return logits[:n, :v], None

    lblp = _pad_axis(labels.astype(jnp.int32).reshape(n, 1), 0, n_pad, value=-1)
    kernel = _make_ce_kernel_single_k(tn) if single_k else _make_ce_kernel_multi_k(tn)
    stats = [pltpu.VMEM((tm, 1), jnp.float32),   # running max (online LSE)
             pltpu.VMEM((tm, 1), jnp.float32),   # running sum-exp
             pltpu.VMEM((tm, 1), jnp.float32)]   # target logit
    scratch = stats if single_k else [pltpu.VMEM((tm, tn), jnp.float32)] + stats
    sems = (("parallel", "arbitrary") if single_k
            else ("parallel", "arbitrary", "arbitrary"))

    logits, loss_part = pl.pallas_call(
        kernel,
        out_shape=(
            jax.ShapeDtypeStruct((n_pad, v_pad), jnp.bfloat16),
            jax.ShapeDtypeStruct((8 * (n_pad // tm), 128), jnp.float32),
        ),
        grid_spec=pltpu.PrefetchScalarGridSpec(
            num_scalar_prefetch=0,
            grid=grid,
            in_specs=[x_spec, w_spec, b_spec, lbl_spec],
            out_specs=(logits_spec, loss_spec),
            scratch_shapes=scratch,
        ),
        compiler_params=pltpu.CompilerParams(
            # row axis "parallel" -> shardable across the 2 TensorCores on v7x;
            # vocab (+ contraction) axes carry m/l/t (+acc) scratch -> "arbitrary".
            dimension_semantics=sems,
            vmem_limit_bytes=vmem_limit,
        ),
    )(xp, wp, bp, lblp)

    loss_sum = jnp.sum(loss_part[0::8, 0])
    return logits[:n, :v], loss_sum


def init_params(key):
    k_wte, k_wpe, k_w, k_b = jax.random.split(key, 4)
    scale = 0.02
    return {
        "wte": scale * jax.random.normal(k_wte, (V, H), jnp.float32),  # token embedding
        "wpe": scale * jax.random.normal(k_wpe, (T, H), jnp.float32),  # positional embedding
        "w":   scale * jax.random.normal(k_w,   (H, V), jnp.float32),  # lm_head weight
        "b":   scale * jax.random.normal(k_b,   (1, V), jnp.float32),  # lm_head bias
    }


class HFModelWrapper:
    """JAX/Pallas port of the PyTorch HFModelWrapper forward:
        logits, loss = model(input_ids, targets=labels)
        return {'logits': logits, ['loss': loss]}
    """

    def __init__(self, params):
        self.params = params
        # Hoisted per perf review: pad + bf16 cast of lm-head weights happens once.
        self._lm_head = prepare_lm_head(params["w"], params["b"])

    def __call__(self, input_ids, labels=None):
        p = self.params
        b, t = input_ids.shape
        # TODO(synk): token/positional embedding gather stays in plain JAX glue.
        x = jnp.take(p["wte"], input_ids, axis=0) + p["wpe"][None, :t, :]
        x2 = x.reshape(b * t, -1).astype(jnp.float32)

        if labels is None:
            logits2, _ = lm_head_fused(x2, self._lm_head, labels=None)
            return {"logits": logits2.astype(jnp.float32).reshape(b, t, -1)}

        lbl = labels.reshape(b * t).astype(jnp.int32)
        logits2, loss_sum = lm_head_fused(x2, self._lm_head, labels=lbl)
        # mean over non-ignored tokens (labels < 0 are ignored, i.e. ignore_index=-1);
        # TODO(synk): HF-style causal label shifting is the wrapped model's job, not done here.
        n_valid = jnp.maximum(jnp.sum((lbl >= 0).astype(jnp.int32)), 1).astype(jnp.float32)
        return {"logits": logits2.astype(jnp.float32).reshape(b, t, -1),
                "loss": loss_sum / n_valid}


if __name__ == "__main__":
    key = jax.random.PRNGKey(0)
    k_params, k_ids, k_lbl = jax.random.split(key, 3)

    params = init_params(k_params)
    model = HFModelWrapper(params)

    input_ids = jax.random.randint(k_ids, (B, T), 0, V, dtype=jnp.int32)
    labels = jax.random.randint(k_lbl, (B, T), 0, V, dtype=jnp.int32)

    out = model(input_ids, labels=labels)
    jax.block_until_ready(out["logits"])
    jax.block_until_ready(out["loss"])

    out_nolabel = model(input_ids, labels=None)
    jax.block_until_ready(out_nolabel["logits"])

    assert out["logits"].shape == (B, T, V)
    assert out["loss"].shape == ()
    assert "loss" not in out_nolabel

    # Reference check (same bf16 operand rounding, f32 math; kernel logits are bf16-stored).
    x = jnp.take(params["wte"], input_ids, axis=0) + params["wpe"][None, :T, :]
    x2 = x.reshape(N, H)
    ref_logits = (x2.astype(jnp.bfloat16).astype(jnp.float32)
                  @ params["w"].astype(jnp.bfloat16).astype(jnp.float32)
                  + params["b"])
    m = jnp.max(ref_logits, axis=-1, keepdims=True)
    ref_lse = (m + jnp.log(jnp.sum(jnp.exp(ref_logits - m), axis=-1, keepdims=True)))[:, 0]
    ref_tgt = jnp.take_along_axis(ref_logits, labels.reshape(N, 1), axis=-1)[:, 0]
    ref_loss = jnp.mean(ref_lse - ref_tgt)

    assert jnp.allclose(out["logits"].reshape(N, V), ref_logits, atol=5e-3, rtol=2e-2)
    assert jnp.allclose(out_nolabel["logits"], out["logits"], atol=1e-6, rtol=1e-6)
    assert jnp.allclose(out["loss"], ref_loss, atol=2e-3, rtol=1e-2)

    # Also exercise the multi-k kernel variant (hidden axis tiled along the contraction).
    prep_mk = prepare_lm_head(params["w"], params["b"], hidden_tiling=(256, 128))
    lbl_flat = labels.reshape(N).astype(jnp.int32)
    logits_mk, loss_mk_sum = lm_head_fused(x2, prep_mk, labels=lbl_flat)
    jax.block_until_ready(logits_mk)
    assert jnp.allclose(logits_mk.astype(jnp.float32),
                        out["logits"].reshape(N, V), atol=5e-3, rtol=2e-2)
    assert jnp.allclose(loss_mk_sum / N, out["loss"], atol=2e-3, rtol=1e-2)

    print("KERNEL_OK")
</pallas_src>

<mosaic_0001>
module attributes {stable_mosaic.version = 11 : i64} {
  func.func @kernel(%arg0: i32, %arg1: i32, %arg2: memref<16x32xbf16, #tpu.memory_space<vmem>>, %arg3: memref<32x128xbf16, #tpu.memory_space<vmem>>, %arg4: memref<1x128xf32, #tpu.memory_space<vmem>>, %arg5: memref<16x1xi32, #tpu.memory_space<vmem>>, %arg6: memref<16x128xbf16, #tpu.memory_space<vmem>>, %arg7: memref<8x128xf32, #tpu.memory_space<vmem>>, %arg8: memref<16x1xf32, #tpu.memory_space<vmem>>, %arg9: memref<16x1xf32, #tpu.memory_space<vmem>>, %arg10: memref<16x1xf32, #tpu.memory_space<vmem>>) attributes {dimension_semantics = [#tpu.dimension_semantics<parallel>, #tpu.dimension_semantics<arbitrary>], iteration_bounds = array<i64: 2, 1>, scalar_prefetch = 0 : i64, scratch_operands = 3 : i64, tpu.core_type = #tpu.core_type<tc>, window_params = [{transform_indices = @transform_0, window_bounds = array<i64: 16, 32>}, {transform_indices = @transform_1, window_bounds = array<i64: 32, 128>}, {transform_indices = @transform_2, window_bounds = array<i64: 1, 128>}, {transform_indices = @transform_3, window_bounds = array<i64: 16, 1>}, {transform_indices = @transform_4, window_bounds = array<i64: 16, 128>}, {transform_indices = @transform_5, window_bounds = array<i64: 8, 128>}]} {
    %c0_i32 = arith.constant 0 : i32
    %0 = arith.cmpi eq, %arg1, %c0_i32 : i32
    %1 = arith.extui %0 : i1 to i32
    %c0_i32_0 = arith.constant 0 : i32
    %2 = arith.cmpi ne, %1, %c0_i32_0 : i32
    scf.if %2 {
      %cst_28 = arith.constant -1.000000e+30 : f32
      %44 = vector.broadcast %cst_28 : f32 to vector<16x1xf32>
      %c0_29 = arith.constant 0 : index
      %c0_30 = arith.constant 0 : index
      %45 = vector.load %arg8[%c0_29, %c0_30] : memref<16x1xf32, #tpu.memory_space<vmem>>, vector<16x1xf32>
      tpu.vector_store %arg8[%c0_29, %c0_30], %44 {strides = array<i32>} : memref<16x1xf32, #tpu.memory_space<vmem>>, vector<16x1xf32>,
      %cst_31 = arith.constant 0.000000e+00 : f32
      %46 = vector.broadcast %cst_31 : f32 to vector<16x1xf32>
      %c0_32 = arith.constant 0 : index
      %c0_33 = arith.constant 0 : index
      %47 = vector.load %arg9[%c0_32, %c0_33] : memref<16x1xf32, #tpu.memory_space<vmem>>, vector<16x1xf32>
      tpu.vector_store %arg9[%c0_32, %c0_33], %46 {strides = array<i32>} : memref<16x1xf32, #tpu.memory_space<vmem>>, vector<16x1xf32>,
      %cst_34 = arith.constant 0.000000e+00 : f32
      %48 = vector.broadcast %cst_34 : f32 to vector<16x1xf32>
      %c0_35 = arith.constant 0 : index
      %c0_36 = arith.constant 0 : index
      %49 = vector.load %arg10[%c0_35, %c0_36] : memref<16x1xf32, #tpu.memory_space<vmem>>, vector<16x1xf32>
      tpu.vector_store %arg10[%c0_35, %c0_36], %48 {strides = array<i32>} : memref<16x1xf32, #tpu.memory_space<vmem>>, vector<16x1xf32>,
    } else {
    }
    %c0 = arith.constant 0 : index
    %c0_1 = arith.constant 0 : index
    %3 = vector.load %arg2[%c0, %c0_1] : memref<16x32xbf16, #tpu.memory_space<vmem>>, vector<16x32xbf16>
    %c0_2 = arith.constant 0 : index
    %c0_3 = arith.constant 0 : index
    %4 = vector.load %arg3[%c0_2, %c0_3] : memref<32x128xbf16, #tpu.memory_space<vmem>>, vector<32x128xbf16>
    %cst = arith.constant dense<0.000000e+00> : vector<16x128xf32>
    %5 = tpu.matmul %3, %4, %cst {dimension_numbers = #tpu.dot_dimension_numbers<[1], [0], [0], [1], [0, 0, 1, 1], [], []>} : vector<16x32xbf16>, vector<32x128xbf16>, vector<16x128xf32> -> vector<16x128xf32>
    %c0_4 = arith.constant 0 : index
    %c0_5 = arith.constant 0 : index
    %6 = vector.load %arg4[%c0_4, %c0_5] : memref<1x128xf32, #tpu.memory_space<vmem>>, vector<1x128xf32>
    %7 = vector.broadcast %6 : vector<1x128xf32> to vector<16x128xf32>
    %8 = arith.addf %5, %7 : vector<16x128xf32>
    %9 = arith.truncf %8 : vector<16x128xf32> to vector<16x128xbf16>
    %c0_6 = arith.constant 0 : index
    %c0_7 = arith.constant 0 : index
    %10 = vector.load %arg6[%c0_6, %c0_7] : memref<16x128xbf16, #tpu.memory_space<vmem>>, vector<16x128xbf16>
    tpu.vector_store %arg6[%c0_6, %c0_7], %9 {strides = array<i32>} : memref<16x128xbf16, #tpu.memory_space<vmem>>, vector<16x128xbf16>,
    %c0_8 = arith.constant 0 : index
    %c0_9 = arith.constant 0 : index
    %11 = vector.load %arg8[%c0_8, %c0_9] : memref<16x1xf32, #tpu.memory_space<vmem>>, vector<16x1xf32>
    %cst_10 = arith.constant dense<0xFF800000> : vector<16xf32>
    %12 = vector.multi_reduction <maximumf>, %8, %cst_10 [1] : vector<16x128xf32> to vector<16xf32>
    %13 = vector.shape_cast %12 : vector<16xf32> to vector<16x1xf32>
    %14 = arith.maximumf %11, %13 : vector<16x1xf32>
    %15 = arith.subf %11, %14 : vector<16x1xf32>
    %16 = math.exp %15 : vector<16x1xf32>
    %17 = vector.broadcast %14 : vector<16x1xf32> to vector<16x128xf32>
    %18 = arith.subf %8, %17 : vector<16x128xf32>
    %19 = math.exp %18 : vector<16x128xf32>
    %c0_11 = arith.constant 0 : index
    %c0_12 = arith.constant 0 : index
    %20 = vector.load %arg9[%c0_11, %c0_12] : memref<16x1xf32, #tpu.memory_space<vmem>>, vector<16x1xf32>
    %21 = arith.mulf %16, %20 : vector<16x1xf32>
    %cst_13 = arith.constant dense<0.000000e+00> : vector<16xf32>
    %22 = vector.multi_reduction <add>, %19, %cst_13 [1] : vector<16x128xf32> to vector<16xf32>
    %23 = vector.shape_cast %22 : vector<16xf32> to vector<16x1xf32>
    %24 = arith.addf %21, %23 : vector<16x1xf32>
    %c0_14 = arith.constant 0 : index
    %c0_15 = arith.constant 0 : index
    %25 = vector.load %arg9[%c0_14, %c0_15] : memref<16x1xf32, #tpu.memory_space<vmem>>, vector<16x1xf32>
    tpu.vector_store %arg9[%c0_14, %c0_15], %24 {strides = array<i32>} : memref<16x1xf32, #tpu.memory_space<vmem>>, vector<16x1xf32>,
    %c0_16 = arith.constant 0 : index
    %c0_17 = arith.constant 0 : index
    %26 = vector.load %arg8[%c0_16, %c0_17] : memref<16x1xf32, #tpu.memory_space<vmem>>, vector<16x1xf32>
    tpu.vector_store %arg8[%c0_16, %c0_17], %14 {strides = array<i32>} : memref<16x1xf32, #tpu.memory_space<vmem>>, vector<16x1xf32>,
    %c0_18 = arith.constant 0 : index
    %c0_19 = arith.constant 0 : index
    %27 = vector.load %arg5[%c0_18, %c0_19] : memref<16x1xi32, #tpu.memory_space<vmem>>, vector<16x1xi32>
    %c128_i32 = arith.constant 128 : i32
    %28 = arith.muli %arg1, %c128_i32 : i32
    %29 = tpu.iota {dimensions = array<i32: 1>} : vector<16x128xi32>
    %30 = vector.broadcast %28 : i32 to vector<16x128xi32>
    %31 = arith.addi %30, %29 : vector<16x128xi32>
    %32 = vector.broadcast %27 : vector<16x1xi32> to vector<16x128xi32>
    %33 = arith.cmpi eq, %31, %32 : vector<16x128xi32>
    %c0_20 = arith.constant 0 : index
    %c0_21 = arith.constant 0 : index
    %34 = vector.load %arg10[%c0_20, %c0_21] : memref<16x1xf32, #tpu.memory_space<vmem>>, vector<16x1xf32>
    %cst_22 = arith.constant 0.000000e+00 : f32
    %35 = vector.broadcast %cst_22 : f32 to vector<16x128xf32>
    %36 = arith.select %33, %8, %35 : vector<16x128xi1>, vector<16x128xf32>
    %cst_23 = arith.constant dense<0.000000e+00> : vector<16xf32>
    %37 = vector.multi_reduction <add>, %36, %cst_23 [1] : vector<16x128xf32> to vector<16xf32>
    %38 = vector.shape_cast %37 : vector<16xf32> to vector<16x1xf32>
    %39 = arith.addf %34, %38 : vector<16x1xf32>
    %c0_24 = arith.constant 0 : index
    %c0_25 = arith.constant 0 : index
    %40 = vector.load %arg10[%c0_24, %c0_25] : memref<16x1xf32, #tpu.memory_space<vmem>>, vector<16x1xf32>
    tpu.vector_store %arg10[%c0_24, %c0_25], %39 {strides = array<i32>} : memref<16x1xf32, #tpu.memory_space<vmem>>, vector<16x1xf32>,
    %c0_i32_26 = arith.constant 0 : i32
    %41 = arith.cmpi eq, %arg1, %c0_i32_26 : i32
    %42 = arith.extui %41 : i1 to i32
    %c0_i32_27 = arith.constant 0 : i32
    %43 = arith.cmpi ne, %42, %c0_i32_27 : i32
    scf.if %43 {
      %c0_28 = arith.constant 0 : index
      %c0_29 = arith.constant 0 : index
      %44 = vector.load %arg8[%c0_28, %c0_29] : memref<16x1xf32, #tpu.memory_space<vmem>>, vector<16x1xf32>
      %c0_30 = arith.constant 0 : index
      %c0_31 = arith.constant 0 : index
      %45 = vector.load %arg9[%c0_30, %c0_31] : memref<16x1xf32, #tpu.memory_space<vmem>>, vector<16x1xf32>
      %46 = math.log %45 : vector<16x1xf32>
      %47 = arith.addf %44, %46 : vector<16x1xf32>
      %c0_i32_32 = arith.constant 0 : i32
      %48 = vector.broadcast %c0_i32_32 : i32 to vector<16x1xi32>
      %49 = arith.cmpi sge, %27, %48 : vector<16x1xi32>
      %c0_33 = arith.constant 0 : index
      %c0_34 = arith.constant 0 : index
      %50 = vector.load %arg10[%c0_33, %c0_34] : memref<16x1xf32, #tpu.memory_space<vmem>>, vector<16x1xf32>
      %51 = arith.subf %47, %50 : vector<16x1xf32>
      %cst_35 = arith.constant 0.000000e+00 : f32
      %52 = vector.broadcast %cst_35 : f32 to vector<16x1xf32>
      %53 = arith.select %49, %51, %52 : vector<16x1xi1>, vector<16x1xf32>
      %54 = vector.shape_cast %53 : vector<16x1xf32> to vector<1x16x1xf32>
      %cst_36 = arith.constant dense<0.000000e+00> : vector<1xf32>
      %55 = vector.multi_reduction <add>, %54, %cst_36 [1, 2] : vector<1x16x1xf32> to vector<1xf32>
      %56 = vector.shape_cast %55 : vector<1xf32> to vector<1x1x1xf32>
      %57 = vector.extract %56[0, 0, 0] : f32 from vector<1x1x1xf32>
      %58 = vector.broadcast %57 : f32 to vector<1x1xf32>
      %cst_37 = arith.constant 0.000000e+00 : f32
      %59 = vector.broadcast %cst_37 : f32 to vector<8x128xf32>
      %60 = vector.broadcast %58 : vector<1x1xf32> to vector<8x128xf32>
      %61 = arith.addf %59, %60 : vector<8x128xf32>
      %c0_38 = arith.constant 0 : index
      %c0_39 = arith.constant 0 : index
      %62 = vector.load %arg7[%c0_38, %c0_39] : memref<8x128xf32, #tpu.memory_space<vmem>>, vector<8x128xf32>
      tpu.vector_store %arg7[%c0_38, %c0_39], %61 {strides = array<i32>} : memref<8x128xf32, #tpu.memory_space<vmem>>, vector<8x128xf32>,
    } else {
    }
    return
  }
  func.func @transform_0(%arg0: i32, %arg1: i32) -> (i32, i32) {
    %c0_i32 = arith.constant 0 : i32
    %c0_i32_0 = arith.constant 0 : i32
    return %arg0, %c0_i32 : i32, i32
  }
  func.func @transform_1(%arg0: i32, %arg1: i32) -> (i32, i32) {
    %c0_i32 = arith.constant 0 : i32
    %c0_i32_0 = arith.constant 0 : i32
    return %c0_i32, %arg1 : i32, i32
  }
  func.func @transform_2(%arg0: i32, %arg1: i32) -> (i32, i32) {
    %c0_i32 = arith.constant 0 : i32
    %c0_i32_0 = arith.constant 0 : i32
    return %c0_i32, %arg1 : i32, i32
  }
  func.func @transform_3(%arg0: i32, %arg1: i32) -> (i32, i32) {
    %c0_i32 = arith.constant 0 : i32
    %c0_i32_0 = arith.constant 0 : i32
    return %arg0, %c0_i32 : i32, i32
  }
  func.func @transform_4(%arg0: i32, %arg1: i32) -> (i32, i32) {
    %c0_i32 = arith.constant 0 : i32
    return %arg0, %arg1 : i32, i32
  }
  func.func @transform_5(%arg0: i32, %arg1: i32) -> (i32, i32) {
    %c0_i32 = arith.constant 0 : i32
    %c0_i32_0 = arith.constant 0 : i32
    return %arg0, %c0_i32 : i32, i32
  }
}

</mosaic_0001>

<bundles_post_ra>
// kernel: tpu_custom_call.1
= control target key start
LH: loop header
LB: loop body
LE: loop exit
PB: predicated region body
PF: predicated region fallthrough
CT: control target
= control target key end

     0   :  { %11 = vsyncpa [#allocation6], 0  ;;  %s1150_s0 = inlined_call_operand.vmem [shape: bf16[32,32], index: 0, kind: input, shape index: {}]   ;;  %s1151_s1 = inlined_call_operand.vmem [shape: bf16[32,128], index: 1, kind: input, shape index: {}]   ;;  %s1152_s2 = inlined_call_operand.vmem [shape: f32[1,128], index: 2, kind: input, shape index: {}]   ;;  %s1153_s3 = inlined_call_operand.vmem [shape: s32[32,1], index: 3, kind: input, shape index: {}]   ;;  %s1154_s4 = inlined_call_operand.hbm [shape: bf16[32,128], index: 4, kind: output, shape index: {0}]   ;;  %s1155_s5 = inlined_call_operand.hbm [shape: f32[16,128], index: 5, kind: output, shape index: {1}]  }
   0x1   :  { %13 = vsyncpa [#allocation6 + $0x1], 0 }
   0x2   :  { %14 = vsyncpa [#allocation8], 0 }
   0x3   :  { %16 = vsyncpa [#allocation8 + $0x1], 0  ;;  %s962_s18 = smov 0   ;;  %s964_s19 = smov 0  }
   0x4   :  { %s966_s20 = smov 0   ;;  %s968_s21 = smov 0  }
   0x5   :  { %s970_s22 = smov 0   ;;  %s972_s23 = smov 0  }
   0x6 LB: > { %s685_s24 = sadd.s32 4294967295, %s922_s23   ;;  %s686_s25 = sadd.s32 4294967294, %s922_s23   ;;  %s922_s23 = sphi %s972_s23, %s22_s23   ;;  %s918_s22 = sphi %s970_s22, %s1162_s22   ;;  %s914_s21 = sphi %s968_s21, %s1161_s21   ;;  %s910_s20 = sphi %s966_s20, %s1160_s20   ;;  %s906_s19 = sphi %s964_s19, %s1159_s19   ;;  %s902_s18 = sphi %s962_s18, %s1158_s18  }
   0x7   : > { %s34_s26 = sadd.s32 1, %s918_s22  ;;  %s147_s27 = sadd.s32 1, %s910_s20 }
   0x8   : > { %p36_p0 = scmp.ge.s32.totalorder %s34_s26, 2  ;;  %p157_p1 = scmp.ne.s32.totalorder %s910_s20, %s906_s19 }
   0x9   : > { %p158_p2 = scmp.eq.s32.totalorder %s685_s24, 1  ;;  %p163_p3 = scmp.ne.s32.totalorder %s906_s19, %s902_s18 }
   0xa   : > { %s1164_s26 = smov (%p36_p0, %s34_s26), 0  ;;  %p164_p5 = scmp.eq.s32.totalorder %s686_s25, 1 }
   0xb   : > { %p1002_p4 = por %p158_p2, %p157_p1  ;;  %s142_s29 = ssub.s32 %s918_s22, %s1164_s26 }
   0xc   : > { %p691_p6 = scmp.ge.s32.totalorder %s922_s23, 1  ;;  %p145_p7 = scmp.eq.s32.totalorder %s142_s29, 0 }
   0xd   : > { %p1009_p8 = por %p164_p5, %p163_p3  ;;  %p239_p9 = scmp.lt.s32.totalorder %s922_s23, 3 }
   0xe   : > { %s1015_s6 = scalar_select %p145_p7, %s910_s20, %s147_s27  }
   0xf   : > { %p240_p10 = pnand %p691_p6, %p239_p9 }
  0x10   : > { %s694_s11 = sshll.u32 (!%p240_p10), %s914_s21, 1  ;;  %s1040_s24 = sand.u32 (!%p240_p10), 1, %s906_s19  }
  0x11   : > { %243 = sbr.rel (%p240_p10) target bundleno = 898 (0x382), region = 36  ;;  %p285_p11 = scmp.lt.s32.totalorder (!%p240_p10), %s694_s11, 3 }
  0x12   : > { %s692_s25 = sshll.u32 (!%p240_p10), %s1040_s24, 3  ;;  %s928_s17 = smov (!%p240_p10), [#allocation5]  }
  0x13   : > { %s1045_s27 = scalar_lea.vmem (!%p240_p10), [#allocation5], %s692_s25 }
  0x14   : > { %s529_s10 = sshll.u32 (!%p240_p10), %s1045_s27, 4  ;;  %s1069_s10 = int_to_ptr.vmem [resolvable:$true] %s529_s10 }
  0x15   : > { %s816_s16 = scalar_lea.vmem (!%p240_p10), %s1069_s10, 128 }
  0x16   : > { %v801_v0 = vld [vmem:[%s1151_s1 + $0x8] sm:$0xff]   ;;  %v924_v1 = vmov 0.0   ;;  %v802_v2 = vld [vmem:[%s1151_s1] sm:$0xff]   ;;  %vm925_vm0 = vmmov 0   ;;  %s1166_s11 = smov (!%p285_p11, %s694_s11), 3  ;;  %vm346_vm1 = vcmask 261120   ;;  %v449_v22 = vlaneseq  ;;  %p817_p12 = scmp.ne.s32.totalorder %s1069_s10, %s816_s16 }
  0x17   : > { %723 = vmatprep.subr.bf16.mxu0 %v924_v1  ;;  %727 = vmatprep.mubr.msk.bf16.mxu0 %vm925_vm0, %v924_v1  ;;  %s695_s12 = sshll.u32 %s1166_s11, 2  ;;  %v926_v4 = vmov 0   ;;  %vm309_vm2 = vcmask 7168   ;;  %v927_v5 = vmov -1e+30   ;;  %s697_s29 = sshll.u32 %s1166_s11, 3 }
  0x18   : > { %724 = vmatpush3.bf16.msra.mxu0 %v801_v0  ;;  %s288_s15 = scalar_lea.vmem %s1150_s0, %s695_s12  ;;  %800 = vset.pattern.permute.xlu0 %v926_v4  ;;  %310 = vst.msk [vmem:[#allocation2] sm:$0xff] %vm309_vm2, %v927_v5  ;;  %311 = vst.msk [vmem:[#allocation2 + $0x8] sm:$0xff] %vm309_vm2, %v927_v5  ;;  %v698_v6 = vld [vmem:[%s1152_s2] ss:$0 sm:$0xff]  ;;  %s301_s9 = scalar_lea.vmem %s1153_s3, %s697_s29  ;;  %v450_v25 = vand.u32 127, %v449_v22 }
  0x19   : > { %725 = vmatprep.subr.bf16.mxu0 %v924_v1  ;;  %v803_v3 = vld [vmem:[%s288_s15] sm:$0xff]   ;;  %799 = vset.pattern.permute.xlu1 %v926_v4  ;;  %312 = vst.msk [vmem:[#allocation3] sm:$0xff] %vm309_vm2, %v924_v1  ;;  %313 = vst.msk [vmem:[#allocation3 + $0x8] sm:$0xff] %vm309_vm2, %v924_v1  ;;  %v1057_v24 = vld [vmem:[%s301_s9 + $0x8] sm:$0xff]  ;;  %s714_s11 = sshll.u32 %s914_s21, 7  ;;  %s510_s15 = scalar_lea.sflag [#allocation6], %s1040_s24 }
  0x1a   : > { %314 = vst.msk [vmem:[#allocation4] sm:$0xff] %vm309_vm2, %v924_v1  ;;  %315 = vst.msk [vmem:[#allocation4 + $0x8] sm:$0xff] %vm309_vm2, %v924_v1  ;;  %v1052_v14 = vld [vmem:[%s301_s9] sm:$0xff]  ;;  %vm487_vm6 = vcmp.ge.s32.totalorder %v1057_v24, 0  ;;  %s1077_s14 = scalar_lea.hbm %s1154_s4, %s714_s11  ;;  %p818_p13 = pnand %p817_p12, %p1002_p4 }
  0x1b   : > { %vm486_vm5 = vcmp.ge.s32.totalorder %v1052_v14, 0 }
  0x1c   : > { %726 = vmatpush3.bf16.msra.mxu0 %v802_v2  ;;  %p819_p0 = pneg %p818_p13 }
  0x1f   : > { %728 = vmatmul.mubr.msk.bf16.vlgmr.msra.gmra.mxu0 %vm346_vm1, %v803_v3  ;;  %v401_v15 = vld [vmem:[#allocation2] sm:$0xff]  ;;  %v402_v18 = vld [vmem:[#allocation2 + $0x8] sm:$0xff] }
  0x20   : > { %v431_v44 = vld [vmem:[#allocation3] sm:$0xff]  ;;  %v432_v48 = vld [vmem:[#allocation3 + $0x8] sm:$0xff] }
  0x21   : > { %v461_v37 = vld [vmem:[#allocation4] sm:$0xff]  ;;  %v462_v53 = vld [vmem:[#allocation4 + $0x8] sm:$0xff] }
  0xdf   : > { %v384_v7 = vpop.f32.mrf.mxu0 }
  0xe0   : > { %v385_v8 = vadd.f32 %v698_v6, %v384_v7 }
  0xe1   : > { %v729_v9 = vpop.f32.mrf.mxu0 }
  0xe2   : > { %403 = vmax.xlane.f32.xlu0 %v385_v8 }
  0xe3   : > { %v387_v10 = vpop.f32.mrf.mxu0 }
  0xe4   : > { %v388_v11 = vadd.f32 %v698_v6, %v387_v10 }
  0xe5   : > { %v730_v12 = vpop.f32.mrf.mxu0 }
  0xe6   : > { %405 = vmax.xlane.f32.xlu0 %v388_v11  ;;  %v718_v13 = vpack.c.bf16 %v388_v11, %v385_v8 }
  0xe8   : > { %719 = vst [vmem:[%s1045_s27] sm:$0xff] %v718_v13   ;;  %s820_s27 = sshll.u32 %s928_s17, 4  ;;  %s821_s27 = int_to_ptr.vmem [resolvable:$false] %s820_s27 }
  0xe9   : > { %s822_s29 = scalar_lea.vmem %s821_s27, 256  ;;  %p823_p1 = scmp.lt.s32.totalorder %s1069_s10, %s821_s27 }
  0xea   : > { %p824_p2 = scmp.lt.s32.totalorder %s822_s29, %s816_s16 }
  0xec   : > { %p825_p3 = por %p824_p2, %p823_p1 }
  0xee   : > { %p826_p5 = pnand %p825_p3, %p819_p0 }
  0xfc   : > { %454 = vperm.xlu0 %800, %v1052_v14  }
 0x16b   : > { %v404_v16 = vpop.xlane.xlu0 %403 }
 0x16c   : > { %v407_v17 = vmax.f32 %v401_v15, %v404_v16 }
 0x16e   : > { %v409_v19 = vsub.f32 %v401_v15, %v407_v17  ;;  %444 = vst.msk [vmem:[#allocation2] sm:$0xff] %vm309_vm2, %v407_v17  ;;  %417 = vperm.xlu1 %799, %v407_v17  }
 0x16f   : > { %v406_v20 = vpop.xlane.xlu0 %405 }
 0x170   : > { %v408_v21 = vmax.f32 %v402_v18, %v406_v20  ;;  %v411_v41 = vmul.f32 1.442695, %v409_v19 }
 0x172   : > { %v410_v23 = vsub.f32 %v402_v18, %v408_v21  ;;  %445 = vst.msk [vmem:[#allocation2 + $0x8] sm:$0xff] %vm309_vm2, %v408_v21  ;;  %422 = vperm.xlu1 %799, %v408_v21  }
 0x174   : > { %v413_v42 = vmul.f32 1.442695, %v410_v23 }
 0x175   : > { %v476_v60 = vld [vmem:[#allocation2] sm:$0xff] }
 0x176   : > { %457 = vperm.xlu1 %799, %v1057_v24  }
 0x177   : > { %v455_v26 = vpop.permute.xlu0 %454 }
 0x178   : > { %vm459_vm3 = vcmp.eq.s32.totalorder %v450_v25, %v455_v26 }
 0x179   : > { %v463_v27 = vsel %vm459_vm3, %v385_v8, 0.0  ;;  %v477_v2 = vld [vmem:[#allocation2 + $0x8] sm:$0xff] }
 0x17a   : > { %465 = vadd.xlane.f32.xlu0 %v463_v27 }
 0x1e9   : > { %v418_v28 = vpop.permute.xlu1 %417 }
 0x1ea   : > { %v425_v29 = vsub.f32 %v385_v8, %v418_v28 }
 0x1ec   : > { %v427_v30 = vmul.f32 1.442695, %v425_v29 }
 0x1ed   : > { %v423_v31 = vpop.permute.xlu1 %422 }
 0x1ee   : > { %804 = vpow2.f32 %v427_v30  ;;  %v426_v32 = vsub.f32 %v388_v11, %v423_v31 }
 0x1f0   : > { %v429_v33 = vmul.f32 1.442695, %v426_v32 }
 0x1f1   : > { %v458_v35 = vpop.permute.xlu1 %457 }
 0x1f2   : > { %806 = vpow2.f32 %v429_v33  ;;  %vm460_vm4 = vcmp.eq.s32.totalorder %v450_v25, %v458_v35 }
 0x1f3   : > { %v464_v39 = vsel %vm460_vm4, %v388_v11, 0.0  ;;  %808 = vpow2.f32 %v411_v41 }
 0x1f4   : > { %810 = vpow2.f32 %v413_v42 }
 0x1fb   : > { %v805_v34 = vpop.eup %804 }
 0x1fc   : > { %435 = vadd.xlane.f32.xlu1 %v805_v34 }
 0x1ff   : > { %v807_v36 = vpop.eup %806 }
 0x200   : > { %437 = vadd.xlane.f32.xlu1 %v807_v36  ;;  %v809_v43 = vpop.eup %808 }
 0x201   : > { %v433_v45 = vmul.f32 %v809_v43, %v431_v44  ;;  %v811_v46 = vpop.eup %810 }
 0x202   : > { %v434_v50 = vmul.f32 %v811_v46, %v432_v48 }
 0x203   : > { %v466_v38 = vpop.xlane.xlu0 %465 }
 0x204   : > { %v469_v40 = vadd.f32 %v466_v38, %v461_v37  ;;  %467 = vadd.xlane.f32.xlu1 %v464_v39 }
 0x206   : > { %471 = vst.msk [vmem:[#allocation4] sm:$0xff] %vm309_vm2, %v469_v40 }
 0x20d   : > { %v488_v63 = vld [vmem:[#allocation4] sm:$0xff] }
 0x285   : > { %v436_v47 = vpop.xlane.xlu1 %435 }
 0x286   : > { %v439_v49 = vadd.f32 %v436_v47, %v433_v45 }
 0x288   : > { %442 = vst.msk [vmem:[#allocation3] sm:$0xff] %vm309_vm2, %v439_v49 }
 0x289   : > { %v438_v51 = vpop.xlane.xlu1 %437 }
 0x28a   : > { %v440_v52 = vadd.f32 %v438_v51, %v434_v50 }
 0x28c   : > { %443 = vst.msk [vmem:[#allocation3 + $0x8] sm:$0xff] %vm309_vm2, %v440_v52 }
 0x28d   : > { %v468_v54 = vpop.xlane.xlu1 %467 }
 0x28e   : > { %v470_v55 = vadd.f32 %v468_v54, %v462_v53 }
 0x28f   : > { %v478_v56 = vld [vmem:[#allocation3] sm:$0xff] }
 0x290   : > { %472 = vst.msk [vmem:[#allocation4 + $0x8] sm:$0xff] %vm309_vm2, %v470_v55  ;;  %812 = vlog2.f32 %v478_v56 }
 0x293   : > { %v479_v57 = vld [vmem:[#allocation3 + $0x8] sm:$0xff] }
 0x294   : > { %814 = vlog2.f32 %v479_v57 }
 0x297   : > { %v489_v4 = vld [vmem:[#allocation4 + $0x8] sm:$0xff] }
 0x29d   : > { %v813_v58 = vpop.eup %812 }
 0x29e   : > { %v481_v59 = vmul.f32 0.6931472, %v813_v58 }
 0x2a0   : > { %v484_v61 = vadd.f32 %v481_v59, %v476_v60 }
 0x2a1   : > { %v815_v62 = vpop.eup %814 }
 0x2a2   : > { %v483_v0 = vmul.f32 0.6931472, %v815_v62  ;;  %v490_v1 = vsub.f32 %v484_v61, %v488_v63 }
 0x2a4   : > { %v485_v3 = vadd.f32 %v483_v0, %v477_v2  ;;  %v492_v6 = vsel %vm486_vm5, %v490_v1, 0.0 }
 0x2a5   : > { %v494_v8 = vsel %vm309_vm2, %v492_v6, 0.0 }
 0x2a6   : > { %v491_v5 = vsub.f32 %v485_v3, %v489_v4 }
 0x2a8   : > { %v493_v7 = vsel %vm487_vm6, %v491_v5, 0.0 }
 0x2a9   : > { %v495_v9 = vsel %vm309_vm2, %v493_v7, 0.0 }
 0x2aa   : > { %v496_v10 = vadd.f32 %v495_v9, %v494_v8 }
 0x2ac   : > { %497 = vadd.xlane.f32.xlu1 %v496_v10 }
 0x2ad   : > { %829 = shalt.err (!%p826_p5)
}
 0x2ae   : > { %s830_s7 = scalar_lea.hbm %s1077_s14, 128  ;;  %s834_s12 = scalar_lea.hbm %s1154_s4, 256 }
 0x2af   : > { %p831_p6 = scmp.ne.s32.totalorder %s1077_s14, %s830_s7  ;;  %p835_p10 = scmp.lt.s32.totalorder %s1077_s14, %s1154_s4 }
 0x2b0   : > { %p836_p11 = scmp.lt.s32.totalorder %s834_s12, %s830_s7 }
 0x2b1   : > { %p832_p7 = pnand %p831_p6, %p1002_p4 }
 0x2b2   : > { %p837_p12 = por %p836_p11, %p835_p10 }
 0x2b3   : > { %p833_p9 = pneg %p832_p7 }
 0x2b5   : > { %p838_p13 = pnand %p837_p12, %p833_p9 }
 0x2b7   : > { %841 = shalt.err (!%p838_p13)
}
 0x2b8   : > { %s929_s16 = smov 64   ;;  %s930_s27 = smov 4  }
 0x2b9   : > { %733 = dma.vmem_to_hbm [thread:$0]  (%p1002_p4), %s1069_s10, 128, %s1077_s14, %s510_s15, %s929_s16, %s929_s16, %s930_s27  }
 0x2ba   : > { %s283_s29 = scalar_lea.vmem [#allocation7], %s692_s25  ;;  %s543_s15 = scalar_lea.hbm %s1155_s5, %s714_s11 }
 0x2bb   : > { %s545_s7 = sshll.u32 %s283_s29, 4  ;;  %s515_s9 = scalar_lea.sflag [#allocation8], %s1040_s24  ;;  %s1104_s7 = int_to_ptr.vmem [resolvable:$true] %s545_s7 }
 0x2bc   : > { %s842_s12 = scalar_lea.vmem %s1104_s7, 128  ;;  %s931_s25 = smov [#allocation7]  }
 0x2bd   : > { %p843_p0 = scmp.ne.s32.totalorder %s1104_s7, %s842_s12  ;;  %s846_s13 = sshll.u32 %s931_s25, 4  ;;  %s847_s13 = int_to_ptr.vmem [resolvable:$false] %s846_s13 }
 0x2be   : > { %s848_s17 = scalar_lea.vmem %s847_s13, 256  ;;  %p849_p3 = scmp.lt.s32.totalorder %s1104_s7, %s847_s13 }
 0x2bf   : > { %p844_p1 = pnand %p843_p0, %p1002_p4  ;;  %p850_p5 = scmp.lt.s32.totalorder %s848_s17, %s842_s12 }
 0x2c1   : > { %p845_p2 = pneg %p844_p1  ;;  %p851_p6 = por %p850_p5, %p849_p3 }
 0x2c3   : > { %p852_p7 = pnand %p851_p6, %p845_p2 }
 0x335   : > { %v498_v11 = vpop.xlane.xlu1 %497 }
 0x336   : > { %v499_v12 = vrot.slane %v498_v11, 4 }
 0x338   : > { %v500_v13 = vadd.f32 %v499_v12, %v498_v11 }
 0x33a   : > { %v501_v14 = vrot.slane %v500_v13, 2 }
 0x33c   : > { %v502_v15 = vadd.f32 %v501_v14, %v500_v13 }
 0x33e   : > { %v503_v16 = vrot.slane %v502_v15, 1 }
 0x340   : > { %v504_v17 = vadd.f32 %v503_v16, %v502_v15 }
 0x342   : > { %731 = vpush %v504_v17 }
 0x373   : > { %s732_s8 = spop %731 }
 0x374   : > { %v506_v18 = vstv %s732_s8 }
 0x375   : > { %508 = vst [vmem:[%s283_s29] sm:$0xff] %v506_v18 }
 0x376   : > { %855 = shalt.err (!%p852_p7)
}
 0x377   : > { %s856_s21 = scalar_lea.hbm %s543_s15, 128  ;;  %s860_s16 = scalar_lea.hbm %s1155_s5, 256 }
 0x378   : > { %p857_p9 = scmp.ne.s32.totalorder %s543_s15, %s856_s21  ;;  %p861_p12 = scmp.lt.s32.totalorder %s543_s15, %s1155_s5 }
 0x379   : > { %p862_p13 = scmp.lt.s32.totalorder %s860_s16, %s856_s21 }
 0x37a   : > { %p858_p10 = pnand %p857_p9, %p1002_p4 }
 0x37b   : > { %p863_p0 = por %p862_p13, %p861_p12 }
 0x37c   : > { %p859_p11 = pneg %p858_p10 }
 0x37e   : > { %p864_p1 = pnand %p863_p0, %p859_p11 }
 0x380   : > { %867 = shalt.err (!%p864_p1)
}
 0x381   : > { %734 = dma.vmem_to_hbm [thread:$0]  (%p1002_p4), %s1104_s7, 128, %s543_s15, %s515_s9  }
 0x382 PF: > { %p744_p2 = scmp.ge.s32.totalorder %s922_s23, 2  ;;  %s557_s8 = sand.u32 1, %s902_s18  }
 0x383   : > { %s558_s10 = scalar_lea.sflag [#allocation6], %s557_s8 }
 0x384   : > { %p738_p3 = pnand %p744_p2, %p1009_p8 }
 0x386   : > { %p739_p5 = pneg %p738_p3 }
 0x388   : > { %893 = dma.done.wait (%p739_p5), %s558_s10, 128  }
 0x389   : > { %895 = vsyncadd (%p739_p5), %s558_s10, 4294967168  ;;  %s567_s14 = scalar_lea.sflag [#allocation8], %s557_s8 }
 0x38a   : > { %897 = dma.done.wait (%p739_p5), %s567_s14, 128  }
 0x38b   : > { %899 = vsyncadd (%p739_p5), %s567_s14, 4294967168  ;;  %s22_s23 = sadd.s32 1, %s922_s23   ;;  %s1158_s18 = smov %s906_s19 }
 0x38c   : > { %p19_p6 = scmp.ge.s32.totalorder %s22_s23, 4   ;;  %s1159_s19 = smov %s910_s20 }
 0x38d   : > { %s1160_s20 = smov %s1015_s6  ;;  %s1161_s21 = smov %s918_s22 }
 0x38e   : > { %s1162_s22 = smov %s1164_s26  ;;  %21 = sbr.rel (!%p19_p6) target bundleno = 6 (0x6), region = 105 }
 0x393   :  { %572 = vsyncpa [#allocation6], 1 }
 0x394   :  { %574 = vsyncpa [#allocation6 + $0x1], 1 }
 0x395   :  { %575 = vsyncpa [#allocation8], 1 }
 0x396   :  { %577 = vsyncpa [#allocation8 + $0x1], 1 }

</bundles_post_ra>
